<compile_context>
chip_gen: v7x
topology: tpu7x:2x2x1
jax: 0.10.0
libtpu: 0.0.40
codegen_flags: <defaults>
</compile_context>

<pallas_src>
import functools
import math

import jax
import jax.numpy as jnp
from jax import lax
from jax.experimental import pallas as pl
from jax.experimental.pallas import tpu as pltpu


# ---------------------------------------------------------------------------
# Config (mirrors the `args` namespace the PyTorch module expects)
# ---------------------------------------------------------------------------
CFG = dict(
    hid_sz=32,
    nheads=2,
    head_dim=16,
    mem_sz=8,                        # M (query length / block size)
    attn_lim=16,                     # expire-span "size"
    expire_span=True,
    expire_span_ramp=8,
    expire_span_loss=1e-3,
    expire_span_pre_div=4.0,
    expire_span_init_percentage=0.2,
    expire_span_noisy=False,
    dropout=0.0,                     # eval mode -> dropout is identity
    pre_norm=False,
    nlayers=2,
)


def _pick_batch_block(B):
    """Largest batch block that keeps >= 2 grid steps (megacore) and divides B."""
    for bt in (32, 16, 8, 4, 2):
        if B % bt == 0 and B // bt >= 2:
            return bt
    return 1


# ---------------------------------------------------------------------------
# Kernel: Bt batches x all heads per grid step
# ---------------------------------------------------------------------------
def _attn_kernel(q_ref, k_ref, v_ref, pb_ref, rem_ref, out_ref, *,
                 Bt, nh, M, L, D, ramp):
    """Block shapes (G = Bt*nh, batch-major over (b, h)):
       q_ref    (G, M, D)        queries, pre-scaled by 1/sqrt(D)
       k_ref    (G, L, D)        keys
       v_ref    (Bt, nh, L, D)   values
       pb_ref   (Bt, nh, M, L)   skewed relative-position bias (pre-scaled)
       rem_ref  (Bt, 1, L)       remaining_offset (head independent)
       out_ref  (Bt, M, nh*D)    attention output, final head-concat layout
    """
    f32 = jnp.float32
    G = Bt * nh

    # ---- head-independent expire-span + causal mask: computed ONCE per step ----
    row_i = lax.broadcasted_iota(jnp.int32, (M, L), 0)
    col_i = lax.broadcasted_iota(jnp.int32, (M, L), 1)
    rem = rem_ref[:, 0, :]                                          # (Bt, L)
    remaining_span = rem[:, None, :] - row_i[None].astype(f32)      # (Bt, M, L)
    emask = jnp.clip(remaining_span * (1.0 / ramp) + 1.0, 0.0, 1.0)
    causal = (col_i <= row_i + (L - M - 1))[None]                   # (1, M, L)
    mask_b = jnp.where(causal, emask, 0.0)                          # (Bt, M, L)
    # Additive fill: large finite instead of -inf so a fully-expired row yields 0
    # instead of NaN (identical result whenever >=1 entry is visible).
    neg_b = jnp.where(mask_b > 0.0, 0.0, -1e30)                     # (Bt, M, L)

    # ---- content scores: ONE MXU matmul batched over all (batch, head) pairs ----
    # bf16 operands, f32 accumulation (1-pass MXU); softmax math stays f32 on the VPU.
    qb = q_ref[...].astype(jnp.bfloat16)
    kb = k_ref[...].astype(jnp.bfloat16)
    s = jnp.einsum("gmd,gld->gml", qb, kb, preferred_element_type=f32)   # (G, M, L)
    s4 = s.reshape(Bt, nh, M, L)
    s4 = s4 + pb_ref[...] + neg_b[:, None]          # pos bias + masked fill (broadcast over nh)

    # ---- ONE masked softmax over the whole slab, folded renormalization ----
    m = jnp.max(s4, axis=-1, keepdims=True)
    e = jnp.exp(s4 - m)
    sum_e = jnp.sum(e, axis=-1, keepdims=True)
    numer = e * mask_b[:, None]
    denom = jnp.sum(numer, axis=-1, keepdims=True) + 1e-8 * sum_e
    # Exact reciprocal keeps us tight to the f32 reference; approx=True uses the EUP slot.
    p4 = numer * pl.reciprocal(denom, approx=False)                 # (Bt, nh, M, L)
    # dropout: identity (eval mode)

    # ---- PV + head-concat assembly: ONE store per grid step ----
    pb16 = p4.astype(jnp.bfloat16)
    v4 = v_ref[...].astype(jnp.bfloat16)                            # (Bt, nh, L, D)
    outs = [jnp.einsum("bml,bld->bmd", pb16[:, h], v4[:, h],
                       preferred_element_type=f32)
            for h in range(nh)]                                     # static, tiny loop
    out_ref[...] = jnp.concatenate(outs, axis=-1)                   # (Bt, M, nh*D)


# ---------------------------------------------------------------------------
# Wrapper (projections, span predictor, aux loss and the positional skew are glue)
# ---------------------------------------------------------------------------
def multi_head_seq_attention(params, cfg, query, kv, c_memory):
    B, M, H = query.shape
    L = kv.shape[1]
    nh, D = cfg["nheads"], cfg["head_dim"]
    P = min(cfg["attn_lim"], cfg["mem_sz"])
    ramp = float(cfg["expire_span_ramp"])
    # the skew formula relies on these invariants
    assert P == M and L >= 2 * M and cfg["expire_span"]

    hi = lax.Precision.HIGHEST          # per-op precision, no global config side effect
    scale = 1.0 / math.sqrt(D)

    # Fused kv-side projection: key | value | span-predictor logit in one matmul.
    w_kvs = jnp.concatenate(
        [params["wk"], params["wv"],
         params["span_w"] / cfg["expire_span_pre_div"]], axis=1)     # (H, 2*nh*D + 1)
    kvs = jnp.dot(kv, w_kvs, precision=hi)
    k = kvs[..., : nh * D]                                           # (B, L, nh*D)
    v = kvs[..., nh * D:2 * nh * D]                                  # (B, L, nh*D)
    max_span = jax.nn.sigmoid(kvs[..., 2 * nh * D] + params["span_b"]) * cfg["attn_lim"]
    remaining_offset = max_span - c_memory                           # (B, L)

    # Auxiliary expire-span loss: head independent -> plain JAX, not in the kernel.
    remaining_span = (remaining_offset[:, None, :]
                      - jnp.arange(M, dtype=jnp.float32)[None, :, None])
    emask = jnp.clip(remaining_span / ramp + 1.0, 0.0, 1.0)
    ramp_mask = jnp.logical_and(emask > 0, emask < 1).astype(jnp.float32)
    aux_loss = ((remaining_span * ramp_mask).sum((-1, -2))
                / ramp / M * cfg["expire_span_loss"])

    # Query projection with 1/sqrt(head_dim) folded into the weight (exact for D=16).
    q = jnp.dot(query, params["wq"] * scale, precision=hi)           # (B, M, nh*D)

    # Relative positional bias: hoisted matmul against the shared (D, P) embedding,
    # then skewed (same pad/reshape trick as the module) into the last 2*M columns
    # of an L-wide bias tile.
    key_pe = params["key_pe"][0]                                     # (D, P)
    q4 = q.reshape(B, M, nh, D)
    pos = jnp.einsum("bmhd,dp->bhmp", q4, key_pe, precision=hi)      # (B, nh, M, P)
    X = jnp.pad(pos, ((0, 0), (0, 0), (0, 0), (0, M + 1)))
    X = X.reshape(B, nh, M * (P + M + 1))[:, :, :-M].reshape(B, nh, M, P + M)
    pos_bias = jnp.pad(X, ((0, 0), (0, 0), (0, 0), (L - 2 * M, 0)))  # (B, nh, M, L)

    # Head-major layouts for the kernel (layout plumbing only).
    q_flat = q4.transpose(0, 2, 1, 3).reshape(B * nh, M, D)          # (B*nh, M, D)
    k_flat = k.reshape(B, L, nh, D).transpose(0, 2, 1, 3).reshape(B * nh, L, D)
    v4 = v.reshape(B, L, nh, D).transpose(0, 2, 1, 3)                # (B, nh, L, D)
    rem3 = remaining_offset[:, None, :]                              # (B, 1, L)

    Bt = _pick_batch_block(B)
    kernel = functools.partial(_attn_kernel, Bt=Bt, nh=nh, M=M, L=L, D=D, ramp=ramp)
    out = pl.pallas_call(
        kernel,
        out_shape=jax.ShapeDtypeStruct((B, M, nh * D), jnp.float32),
        grid_spec=pltpu.PrefetchScalarGridSpec(
            num_scalar_prefetch=0,
            grid=(B // Bt,),
            in_specs=[
                pl.BlockSpec((Bt * nh, M, D), lambda i: (i, 0, 0)),
                pl.BlockSpec((Bt * nh, L, D), lambda i: (i, 0, 0)),
                pl.BlockSpec((Bt, nh, L, D), lambda i: (i, 0, 0, 0)),
                pl.BlockSpec((Bt, nh, M, L), lambda i: (i, 0, 0, 0)),
                pl.BlockSpec((Bt, 1, L), lambda i: (i, 0, 0)),
            ],
            out_specs=pl.BlockSpec((Bt, M, nh * D), lambda i: (i, 0, 0)),
        ),
        compiler_params=pltpu.CompilerParams(
            dimension_semantics=("parallel",),
            vmem_limit_bytes=32 * 1024 * 1024,   # explicit; safe on v5e/v6e and v7x (64 MiB)
        ),
    )(q_flat, k_flat, v4, pos_bias, rem3)

    out = jnp.dot(out, params["wo"], precision=hi)
    return out, aux_loss, remaining_offset


# ---------------------------------------------------------------------------
# Pure-JAX reference (mirrors the PyTorch forward exactly, incl. pad/reshape skew)
# ---------------------------------------------------------------------------
def reference_forward(params, cfg, query, kv, c_memory):
    B, M, H = query.shape
    L = kv.shape[1]
    nh, D = cfg["nheads"], cfg["head_dim"]
    ramp = float(cfg["expire_span_ramp"])
    hi = lax.Precision.HIGHEST

    def head_reshape(x):
        Bx, T, _ = x.shape
        return x.reshape(Bx, T, nh, D).transpose(0, 2, 1, 3).reshape(Bx * nh, T, D)

    q = head_reshape(jnp.dot(query, params["wq"], precision=hi))
    k = head_reshape(jnp.dot(kv, params["wk"], precision=hi))
    v = head_reshape(jnp.dot(kv, params["wv"], precision=hi))

    attn = jnp.einsum("bmd,bld->bml", q, k, precision=hi)

    max_span = jax.nn.sigmoid(
        jnp.dot(kv / cfg["expire_span_pre_div"], params["span_w"], precision=hi)
        + params["span_b"])[..., 0]
    max_span = max_span * cfg["attn_lim"]
    remaining_offset = max_span - c_memory
    remaining_span = (remaining_offset[:, None, :]
                      - jnp.arange(M, dtype=jnp.float32)[None, :, None])
    emask = jnp.clip(remaining_span / ramp + 1.0, 0.0, 1.0)
    ramp_mask = jnp.logical_and(emask > 0, emask < 1).astype(jnp.float32)
    loss = (remaining_span * ramp_mask).sum((-1, -2)) / ramp / M * cfg["expire_span_loss"]

    mask = jnp.repeat(emask, nh, axis=0)                             # (B*nh, M, L)
    col = jnp.arange(L)[None, :]
    row = jnp.arange(M)[:, None]
    causal = (col <= row + (L - M - 1)).astype(jnp.float32)
    mask = mask * causal[None]

    key_pe = params["key_pe"][0]
    P = key_pe.shape[1]
    attn_pos = jnp.einsum("bmd,dp->bmp", q, key_pe, precision=hi)    # (B*nh, M, P)
    X = jnp.pad(attn_pos, ((0, 0), (0, 0), (0, M + 1)))
    X = X.reshape(B * nh, -1)[:, :-M].reshape(B * nh, M, P + M)      # skew
    attn = attn.at[:, :, L - 2 * M:].add(X)

    attn = jnp.where(mask == 0, -jnp.inf, attn)
    attn = attn / math.sqrt(D)
    attn = jax.nn.softmax(attn, axis=-1)
    attn = attn * mask
    attn = attn / (attn.sum(-1, keepdims=True) + 1e-8)
    out = jnp.einsum("bml,bld->bmd", attn, v, precision=hi)
    out = out.reshape(B, nh, M, D).transpose(0, 2, 1, 3).reshape(B, M, nh * D)
    out = jnp.dot(out, params["wo"], precision=hi)
    return out, loss, remaining_offset


# ---------------------------------------------------------------------------
# Deterministic parameter init (shapes from the module __init__)
# ---------------------------------------------------------------------------
def init_params(cfg, rng):
    H, nh, D = cfg["hid_sz"], cfg["nheads"], cfg["head_dim"]
    P = min(cfg["attn_lim"], cfg["mem_sz"])
    keys = jax.random.split(rng, 6)
    wq = jax.random.normal(keys[0], (H, nh * D), jnp.float32) / math.sqrt(H)
    wk = jax.random.normal(keys[1], (H, nh * D), jnp.float32) / math.sqrt(H)
    wv = jax.random.normal(keys[2], (H, nh * D), jnp.float32) / math.sqrt(H)
    wo = jax.random.normal(keys[3], (nh * D, H), jnp.float32) / math.sqrt(nh * D)
    if cfg["pre_norm"]:
        wo = wo / math.sqrt(cfg["nlayers"] * 2)
    key_pe = jax.random.normal(keys[4], (1, D, P), jnp.float32) / math.sqrt(D)
    # span_predictor: module sets weight=0, bias=b; use a tiny deterministic weight
    # so the memory (L) axis is actually exercised by the kernel.
    span_b = -math.log(1.0 / cfg["expire_span_init_percentage"] - 1.0)
    span_w = jax.random.normal(keys[5], (H, 1), jnp.float32) * 0.02
    return dict(wq=wq, wk=wk, wv=wv, wo=wo, key_pe=key_pe,
                span_w=span_w, span_b=jnp.float32(span_b))


if __name__ == "__main__":
    cfg = CFG
    B, M, L, H = 2, cfg["mem_sz"], 24, cfg["hid_sz"]

    rng = jax.random.PRNGKey(0)
    k_param, k_q, k_kv = jax.random.split(rng, 3)
    params = init_params(cfg, k_param)

    query = jax.random.normal(k_q, (B, M, H), jnp.float32)
    kv = jax.random.normal(k_kv, (B, L, H), jnp.float32)   # key is value is memory_hid
    c_memory = jnp.broadcast_to(
        jnp.arange(L - 1, -1, -1, dtype=jnp.float32) * 0.5, (B, L))

    fwd = jax.jit(functools.partial(multi_head_seq_attention, params, cfg))
    out, aux_loss, spans = fwd(query, kv, c_memory)
    jax.block_until_ready(out)

    ref_out, ref_loss, ref_spans = reference_forward(params, cfg, query, kv, c_memory)
    # Kernel uses bf16 MXU operands (f32 accumulation) vs an all-f32 reference, so the
    # comparison tolerance is at the bf16 operand-quantization level (~2^-9 relative).
    max_err = float(jnp.max(jnp.abs(out - ref_out)))
    assert jnp.allclose(out, ref_out, atol=2e-2, rtol=1e-2), \
        f"out mismatch, max abs err = {max_err}"
    assert jnp.allclose(aux_loss, ref_loss, atol=1e-5, rtol=1e-4), "aux_loss mismatch"
    assert jnp.allclose(spans, ref_spans, atol=1e-5, rtol=1e-5), "spans mismatch"

    print("KERNEL_OK")
</pallas_src>

<mosaic_0001>
module attributes {stable_mosaic.version = 11 : i64} {
  func.func @_attn_kernel(%arg0: i32, %arg1: memref<2x8x16xf32, #tpu.memory_space<vmem>>, %arg2: memref<2x24x16xf32, #tpu.memory_space<vmem>>, %arg3: memref<1x2x24x16xf32, #tpu.memory_space<vmem>>, %arg4: memref<1x2x8x24xf32, #tpu.memory_space<vmem>>, %arg5: memref<1x1x24xf32, #tpu.memory_space<vmem>>, %arg6: memref<1x8x32xf32, #tpu.memory_space<vmem>>) attributes {dimension_semantics = [#tpu.dimension_semantics<parallel>], iteration_bounds = array<i64: 2>, scalar_prefetch = 0 : i64, scratch_operands = 0 : i64, tpu.core_type = #tpu.core_type<tc>, window_params = [{transform_indices = @transform_0, window_bounds = array<i64: 2, 8, 16>}, {transform_indices = @transform_1, window_bounds = array<i64: 2, 24, 16>}, {transform_indices = @transform_2, window_bounds = array<i64: 1, 2, 24, 16>}, {transform_indices = @transform_3, window_bounds = array<i64: 1, 2, 8, 24>}, {transform_indices = @transform_4, window_bounds = array<i64: 1, 1, 24>}, {transform_indices = @transform_5, window_bounds = array<i64: 1, 8, 32>}]} {
    %0 = tpu.iota {dimensions = array<i32: 0>} : vector<8x24xi32>
    %1 = tpu.iota {dimensions = array<i32: 1>} : vector<8x24xi32>
    %c0 = arith.constant 0 : index
    %c0_0 = arith.constant 0 : index
    %c0_1 = arith.constant 0 : index
    %2 = vector.load %arg5[%c0, %c0_0, %c0_1] : memref<1x1x24xf32, #tpu.memory_space<vmem>>, vector<1x1x24xf32>
    %3 = vector.shape_cast %2 : vector<1x1x24xf32> to vector<1x24xf32>
    %4 = vector.shape_cast %3 : vector<1x24xf32> to vector<1x1x24xf32>
    %5 = vector.shape_cast %0 : vector<8x24xi32> to vector<1x8x24xi32>
    %6 = arith.sitofp %5 : vector<1x8x24xi32> to vector<1x8x24xf32>
    %7 = vector.broadcast %4 : vector<1x1x24xf32> to vector<1x8x24xf32>
    %8 = arith.subf %7, %6 : vector<1x8x24xf32>
    %cst = arith.constant 1.250000e-01 : f32
    %9 = vector.broadcast %cst : f32 to vector<1x8x24xf32>
    %10 = arith.mulf %8, %9 : vector<1x8x24xf32>
    %cst_2 = arith.constant 1.000000e+00 : f32
    %11 = vector.broadcast %cst_2 : f32 to vector<1x8x24xf32>
    %12 = arith.addf %10, %11 : vector<1x8x24xf32>
    %cst_3 = arith.constant 0.000000e+00 : f32
    %cst_4 = arith.constant 1.000000e+00 : f32
    %13 = vector.broadcast %cst_3 : f32 to vector<1x8x24xf32>
    %14 = arith.maximumf %13, %12 : vector<1x8x24xf32>
    %15 = vector.broadcast %cst_4 : f32 to vector<1x8x24xf32>
    %16 = arith.minimumf %15, %14 : vector<1x8x24xf32>
    %c15_i32 = arith.constant 15 : i32
    %17 = vector.broadcast %c15_i32 : i32 to vector<8x24xi32>
    %18 = arith.addi %0, %17 : vector<8x24xi32>
    %19 = arith.cmpi sle, %1, %18 : vector<8x24xi32>
    %20 = vector.shape_cast %19 : vector<8x24xi1> to vector<1x8x24xi1>
    %cst_5 = arith.constant 0.000000e+00 : f32
    %21 = vector.broadcast %cst_5 : f32 to vector<1x8x24xf32>
    %22 = arith.select %20, %16, %21 : vector<1x8x24xi1>, vector<1x8x24xf32>
    %cst_6 = arith.constant 0.000000e+00 : f32
    %23 = vector.broadcast %cst_6 : f32 to vector<1x8x24xf32>
    %24 = arith.cmpf ogt, %22, %23 : vector<1x8x24xf32>
    %cst_7 = arith.constant 0.000000e+00 : f32
    %cst_8 = arith.constant -1.000000e+30 : f32
    %25 = vector.broadcast %cst_7 : f32 to vector<1x8x24xf32>
    %26 = vector.broadcast %cst_8 : f32 to vector<1x8x24xf32>
    %27 = arith.select %24, %25, %26 : vector<1x8x24xi1>, vector<1x8x24xf32>
    %c0_9 = arith.constant 0 : index
    %c0_10 = arith.constant 0 : index
    %c0_11 = arith.constant 0 : index
    %28 = vector.load %arg1[%c0_9, %c0_10, %c0_11] : memref<2x8x16xf32, #tpu.memory_space<vmem>>, vector<2x8x16xf32>
    %29 = arith.truncf %28 : vector<2x8x16xf32> to vector<2x8x16xbf16>
    %c0_12 = arith.constant 0 : index
    %c0_13 = arith.constant 0 : index
    %c0_14 = arith.constant 0 : index
    %30 = vector.load %arg2[%c0_12, %c0_13, %c0_14] : memref<2x24x16xf32, #tpu.memory_space<vmem>>, vector<2x24x16xf32>
    %31 = arith.truncf %30 : vector<2x24x16xf32> to vector<2x24x16xbf16>
    "tpu.trace_start"() <{level = 10 : i32, message = "gmd,gld->gml"}> : () -> ()
    %cst_15 = arith.constant dense<0.000000e+00> : vector<2x8x24xf32>
    %32 = tpu.matmul %29, %31, %cst_15 {dimension_numbers = #tpu.dot_dimension_numbers<[2], [2], [1], [1], [0, 0, 0, 1, 1, 1], [0], [0]>} : vector<2x8x16xbf16>, vector<2x24x16xbf16>, vector<2x8x24xf32> -> vector<2x8x24xf32>
    "tpu.trace_stop"() : () -> ()
    %33 = vector.shape_cast %32 : vector<2x8x24xf32> to vector<1x2x8x24xf32>
    %c0_16 = arith.constant 0 : index
    %c0_17 = arith.constant 0 : index
    %c0_18 = arith.constant 0 : index
    %c0_19 = arith.constant 0 : index
    %34 = vector.load %arg4[%c0_16, %c0_17, %c0_18, %c0_19] : memref<1x2x8x24xf32, #tpu.memory_space<vmem>>, vector<1x2x8x24xf32>
    %35 = arith.addf %33, %34 : vector<1x2x8x24xf32>
    %36 = vector.shape_cast %27 : vector<1x8x24xf32> to vector<1x1x8x24xf32>
    %37 = vector.broadcast %36 : vector<1x1x8x24xf32> to vector<1x2x8x24xf32>
    %38 = arith.addf %35, %37 : vector<1x2x8x24xf32>
    %cst_20 = arith.constant dense<0xFF800000> : vector<1x2x8xf32>
    %39 = vector.multi_reduction <maximumf>, %38, %cst_20 [3] : vector<1x2x8x24xf32> to vector<1x2x8xf32>
    %40 = vector.shape_cast %39 : vector<1x2x8xf32> to vector<1x2x8x1xf32>
    %41 = vector.broadcast %40 : vector<1x2x8x1xf32> to vector<1x2x8x24xf32>
    %42 = arith.subf %38, %41 : vector<1x2x8x24xf32>
    %43 = math.exp %42 : vector<1x2x8x24xf32>
    %cst_21 = arith.constant dense<0.000000e+00> : vector<1x2x8xf32>
    %44 = vector.multi_reduction <add>, %43, %cst_21 [3] : vector<1x2x8x24xf32> to vector<1x2x8xf32>
    %45 = vector.shape_cast %44 : vector<1x2x8xf32> to vector<1x2x8x1xf32>
    %46 = vector.shape_cast %22 : vector<1x8x24xf32> to vector<1x1x8x24xf32>
    %47 = vector.broadcast %46 : vector<1x1x8x24xf32> to vector<1x2x8x24xf32>
    %48 = arith.mulf %43, %47 : vector<1x2x8x24xf32>
    %cst_22 = arith.constant dense<0.000000e+00> : vector<1x2x8xf32>
    %49 = vector.multi_reduction <add>, %48, %cst_22 [3] : vector<1x2x8x24xf32> to vector<1x2x8xf32>
    %50 = vector.shape_cast %49 : vector<1x2x8xf32> to vector<1x2x8x1xf32>
    %cst_23 = arith.constant 9.99999993E-9 : f32
    %51 = vector.broadcast %cst_23 : f32 to vector<1x2x8x1xf32>
    %52 = arith.mulf %51, %45 : vector<1x2x8x1xf32>
    %53 = arith.addf %50, %52 : vector<1x2x8x1xf32>
    %54 = tpu.reciprocal %53 : vector<1x2x8x1xf32> -> vector<1x2x8x1xf32>
    %55 = vector.broadcast %54 : vector<1x2x8x1xf32> to vector<1x2x8x24xf32>
    %56 = arith.mulf %48, %55 : vector<1x2x8x24xf32>
    %57 = arith.truncf %56 : vector<1x2x8x24xf32> to vector<1x2x8x24xbf16>
    %c0_24 = arith.constant 0 : index
    %c0_25 = arith.constant 0 : index
    %c0_26 = arith.constant 0 : index
    %c0_27 = arith.constant 0 : index
    %58 = vector.load %arg3[%c0_24, %c0_25, %c0_26, %c0_27] : memref<1x2x24x16xf32, #tpu.memory_space<vmem>>, vector<1x2x24x16xf32>
    %59 = arith.truncf %58 : vector<1x2x24x16xf32> to vector<1x2x24x16xbf16>
    %60 = vector.extract_strided_slice %57 {offsets = [0, 0, 0, 0], sizes = [1, 1, 8, 24], strides = [1, 1, 1, 1]} : vector<1x2x8x24xbf16> to vector<1x1x8x24xbf16>
    %61 = vector.shape_cast %60 : vector<1x1x8x24xbf16> to vector<1x8x24xbf16>
    %62 = vector.extract_strided_slice %59 {offsets = [0, 0, 0, 0], sizes = [1, 1, 24, 16], strides = [1, 1, 1, 1]} : vector<1x2x24x16xbf16> to vector<1x1x24x16xbf16>
    %63 = vector.shape_cast %62 : vector<1x1x24x16xbf16> to vector<1x24x16xbf16>
    "tpu.trace_start"() <{level = 10 : i32, message = "bml,bld->bmd"}> : () -> ()
    %cst_28 = arith.constant dense<0.000000e+00> : vector<1x8x16xf32>
    %64 = tpu.matmul %61, %63, %cst_28 {dimension_numbers = #tpu.dot_dimension_numbers<[2], [1], [1], [2], [0, 0, 0, 1, 1, 2], [0], [0]>} : vector<1x8x24xbf16>, vector<1x24x16xbf16>, vector<1x8x16xf32> -> vector<1x8x16xf32>
    "tpu.trace_stop"() : () -> ()
    %65 = vector.extract_strided_slice %57 {offsets = [0, 1, 0, 0], sizes = [1, 1, 8, 24], strides = [1, 1, 1, 1]} : vector<1x2x8x24xbf16> to vector<1x1x8x24xbf16>
    %66 = vector.shape_cast %65 : vector<1x1x8x24xbf16> to vector<1x8x24xbf16>
    %67 = vector.extract_strided_slice %59 {offsets = [0, 1, 0, 0], sizes = [1, 1, 24, 16], strides = [1, 1, 1, 1]} : vector<1x2x24x16xbf16> to vector<1x1x24x16xbf16>
    %68 = vector.shape_cast %67 : vector<1x1x24x16xbf16> to vector<1x24x16xbf16>
    "tpu.trace_start"() <{level = 10 : i32, message = "bml,bld->bmd"}> : () -> ()
    %cst_29 = arith.constant dense<0.000000e+00> : vector<1x8x16xf32>
    %69 = tpu.matmul %66, %68, %cst_29 {dimension_numbers = #tpu.dot_dimension_numbers<[2], [1], [1], [2], [0, 0, 0, 1, 1, 2], [0], [0]>} : vector<1x8x24xbf16>, vector<1x24x16xbf16>, vector<1x8x16xf32> -> vector<1x8x16xf32>
    "tpu.trace_stop"() : () -> ()
    %70 = tpu.concatenate %64, %69 in 2 : vector<1x8x16xf32>, vector<1x8x16xf32> -> vector<1x8x32xf32>
    %c0_30 = arith.constant 0 : index
    %c0_31 = arith.constant 0 : index
    %c0_32 = arith.constant 0 : index
    %71 = vector.load %arg6[%c0_30, %c0_31, %c0_32] : memref<1x8x32xf32, #tpu.memory_space<vmem>>, vector<1x8x32xf32>
    tpu.vector_store %arg6[%c0_30, %c0_31, %c0_32], %70 {strides = array<i32>} : memref<1x8x32xf32, #tpu.memory_space<vmem>>, vector<1x8x32xf32>,
    return
  }
  func.func @transform_0(%arg0: i32) -> (i32, i32, i32) {
    %c0_i32 = arith.constant 0 : i32
    %c0_i32_0 = arith.constant 0 : i32
    %c0_i32_1 = arith.constant 0 : i32
    return %arg0, %c0_i32, %c0_i32_0 : i32, i32, i32
  }
  func.func @transform_1(%arg0: i32) -> (i32, i32, i32) {
    %c0_i32 = arith.constant 0 : i32
    %c0_i32_0 = arith.constant 0 : i32
    %c0_i32_1 = arith.constant 0 : i32
    return %arg0, %c0_i32, %c0_i32_0 : i32, i32, i32
  }
  func.func @transform_2(%arg0: i32) -> (i32, i32, i32, i32) {
    %c0_i32 = arith.constant 0 : i32
    %c0_i32_0 = arith.constant 0 : i32
    %c0_i32_1 = arith.constant 0 : i32
    %c0_i32_2 = arith.constant 0 : i32
    return %arg0, %c0_i32, %c0_i32_0, %c0_i32_1 : i32, i32, i32, i32
  }
  func.func @transform_3(%arg0: i32) -> (i32, i32, i32, i32) {
    %c0_i32 = arith.constant 0 : i32
    %c0_i32_0 = arith.constant 0 : i32
    %c0_i32_1 = arith.constant 0 : i32
    %c0_i32_2 = arith.constant 0 : i32
    return %arg0, %c0_i32, %c0_i32_0, %c0_i32_1 : i32, i32, i32, i32
  }
  func.func @transform_4(%arg0: i32) -> (i32, i32, i32) {
    %c0_i32 = arith.constant 0 : i32
    %c0_i32_0 = arith.constant 0 : i32
    %c0_i32_1 = arith.constant 0 : i32
    return %arg0, %c0_i32, %c0_i32_0 : i32, i32, i32
  }
  func.func @transform_5(%arg0: i32) -> (i32, i32, i32) {
    %c0_i32 = arith.constant 0 : i32
    %c0_i32_0 = arith.constant 0 : i32
    %c0_i32_1 = arith.constant 0 : i32
    return %arg0, %c0_i32, %c0_i32_0 : i32, i32, i32
  }
}

</mosaic_0001>

<bundles_post_ra>
// kernel: multi_head_seq_attention.1
= control target key start
LH: loop header
LB: loop body
LE: loop exit
PB: predicated region body
PF: predicated region fallthrough
CT: control target
= control target key end

     0   :  { %s820_s18 = smov 0   ;;  %s891_s0 = inlined_call_operand.vmem [shape: f32[4,8,16], index: 0, kind: input, shape index: {}]   ;;  %s892_s1 = inlined_call_operand.vmem [shape: f32[4,24,16], index: 1, kind: input, shape index: {}]   ;;  %s893_s2 = inlined_call_operand.vmem [shape: f32[2,2,24,16], index: 2, kind: input, shape index: {}]   ;;  %s894_s3 = inlined_call_operand.vmem [shape: f32[2,2,8,24], index: 3, kind: input, shape index: {}]   ;;  %s895_s4 = inlined_call_operand.vmem [shape: f32[2,1,24], index: 4, kind: input, shape index: {}]   ;;  %s896_s5 = inlined_call_operand.vmem [shape: f32[2,8,32], index: 5, kind: output, shape index: {}]  }
   0x1 LB: > { %s826_s19 = sadd.s32 4294967295, %s784_s18   ;;  %p695_p0 = scmp.ge.s32.totalorder %s784_s18, 1  ;;  %s784_s18 = sphi %s820_s18, %s15_s18  }
   0x2   : > { %p228_p1 = scmp.lt.s32.totalorder %s784_s18, 3 }
   0x4   : > { %p229_p2 = pnand %p695_p0, %p228_p1 }
   0x5   : > { %s696_s20 = sshll.u32 (!%p229_p2), %s826_s19, 1  ;;  %v786_v0 = vmov (!%p229_p2), 0.0   ;;  %vm787_vm0 = vmmov (!%p229_p2), 0   ;;  %vm341_vm1 = vcmask (!%p229_p2), 130048   ;;  %p287_p4 = scmp.lt.s32.totalorder (!%p229_p2), %s826_s19, 1  ;;  %v305_v19 = vlaneseq (!%p229_p2) }
   0x6   : > { %232 = sbr.rel (%p229_p2) target bundleno = 903 (0x387), region = 40  ;;  %732 = vmatprep.subr.bf16.mxu1 (!%p229_p2), %v786_v0  ;;  %p275_p3 = scmp.lt.s32.totalorder (!%p229_p2), %s696_s20, 3  ;;  %724 = vmatprep.subr.bf16.mxu0 (!%p229_p2), %v786_v0  ;;  %v788_v34 = vmov (!%p229_p2), -1e+30   ;;  %vm446_vm4 = vcmask (!%p229_p2), 195584   ;;  %vm496_vm5 = vcmask (!%p229_p2), 1043456  }
   0x7   : > { %736 = vmatprep.mubr.msk.bf16.mxu1 (!%p229_p2), %vm787_vm0, %v786_v0  ;;  %728 = vmatprep.mubr.msk.bf16.mxu0 (!%p229_p2), %vm787_vm0, %v786_v0  ;;  %v306_v20 = vshrl.u32 (!%p229_p2), %v305_v19, 7  ;;  %v308_v27 = vand.u32 (!%p229_p2), 127, %v305_v19  ;;  %s789_s15 = smov (!%p229_p2), 16   ;;  %vm591_vm6 = vcmask (!%p229_p2), 261120  }
   0x9   : > { %v310_v21 = vcvt.s32.f32 (!%p229_p2), %v306_v20  ;;  %v322_v28 = vadd.s32 (!%p229_p2), 15, %v306_v20 }
   0xb   : > { %vm323_vm2 = vcmp.le.s32.totalorder (!%p229_p2), %v308_v27, %v322_v28 }
   0xd   : > { %s898_s20 = smov (!%p275_p3, %s696_s20), 3  ;;  %s900_s19 = smov (!%p287_p4, %s826_s19), 1 }
   0xe   : > { %s756_s21 = smul.u32 24, %s898_s20  ;;  %s697_s25 = sshll.u32 %s898_s20, 3 }
   0xf   : > { %s278_s28 = scalar_lea.vmem %s891_s0, %s697_s25  ;;  %s299_s6 = scalar_lea.vmem %s895_s4, %s900_s19 }
  0x10   : > { %s285_s24 = scalar_lea.vmem %s892_s1, %s756_s21  ;;  %v328_v15 = vld [vmem:[%s278_s28 + $0x8] sm:$0xff]  ;;  %v327_v16 = vld [vmem:[%s278_s28] sm:$0xff]  ;;  %s711_s7 = sshll.u32 %s900_s19, 4 }
  0x11   : > { %v334_v1 = vld [vmem:[%s285_s24 + $0x18] sm:$0xff]  ;;  %v335_v2 = vld [vmem:[%s285_s24 + $0x20] sm:$0xff]  ;;  %v332_v5 = vld [vmem:[%s285_s24 + $0x8] sm:$0xff]  ;;  %v330_v17 = vpack.c.bf16 %v328_v15, %v328_v15  ;;  %v329_v18 = vpack.c.bf16 %v327_v16, %v327_v16  ;;  %s296_s10 = scalar_lea.vmem %s894_s3, %s711_s7  ;;  %s757_s11 = smul.u32 48, %s900_s19 }
  0x12   : > { %v331_v3 = vld [vmem:[%s285_s24] sm:$0xff]  ;;  %v339_v4 = vpack.c.bf16 %v335_v2, %v334_v1  ;;  %v336_v7 = vld [vmem:[%s285_s24 + $0x28] sm:$0xff]  ;;  %v333_v9 = vld [vmem:[%s285_s24 + $0x10] sm:$0xff]  ;;  %s703_s16 = sshll.u32 %s900_s19, 3 }
  0x13   : > { %v337_v6 = vpack.c.bf16 %v332_v5, %v331_v3  ;;  %v340_v11 = vpack.c.bf16 %v336_v7, %v336_v7  ;;  %v338_v12 = vpack.c.bf16 %v333_v9, %v333_v9  ;;  %v704_v22 = vld [vmem:[%s299_s6] ss:$0 sm:$0xff]  ;;  %v441_v31 = vld [vmem:[%s296_s10 + $0x8] sm:$0xff]  ;;  %s291_s14 = scalar_lea.vmem %s893_s2, %s757_s11  ;;  %s303_s21 = scalar_lea.vmem %s896_s5, %s703_s16 }
  0x14   : > { %v395_v8 = vsel %vm341_vm1, %v339_v4, 0  ;;  %v317_v23 = vsub.f32 %v704_v22, %v310_v21  ;;  %v440_v32 = vld [vmem:[%s296_s10] sm:$0xff]  ;;  %v486_v63 = vld [vmem:[%s291_s14 + $0x18] sm:$0xff]  ;;  %v488_v3 = vld [vmem:[%s291_s14 + $0x28] sm:$0xff] }
  0x15   : > { %733 = vmatpush3.bf16.xpose.msra.mxu1 %v395_v8  ;;  %v346_v10 = vsel %vm341_vm1, %v337_v6, 0  ;;  %v398_v13 = vsel %vm341_vm1, %v340_v11, 0  ;;  %v349_v14 = vsel %vm341_vm1, %v338_v12, 0  ;;  %v487_v1 = vld [vmem:[%s291_s14 + $0x20] sm:$0xff]  ;;  %v492_v4 = vpack.c.bf16 %v488_v3, %v488_v3  ;;  %v484_v6 = vld [vmem:[%s291_s14 + $0x8] sm:$0xff]  ;;  %v485_v9 = vld [vmem:[%s291_s14 + $0x10] sm:$0xff] }
  0x16   : > { %725 = vmatpush3.bf16.xpose.msra.mxu0 %v346_v10  ;;  %734 = vmatprep.subr.bf16.mxu1 %v786_v0  ;;  %v318_v24 = vmul.f32 0.125, %v317_v23  ;;  %v491_v2 = vpack.c.bf16 %v487_v1, %v486_v63  ;;  %v483_v5 = vld [vmem:[%s291_s14] sm:$0xff]  ;;  %v490_v10 = vpack.c.bf16 %v485_v9, %v485_v9 }
  0x17   : > { %726 = vmatprep.subr.bf16.mxu0 %v786_v0  ;;  %v489_v7 = vpack.c.bf16 %v484_v6, %v483_v5  ;;  %v544_v8 = vsel %vm496_vm5, %v492_v4, 0 }
  0x18   : > { %v319_v25 = vadd.f32 1.0, %v318_v24  ;;  %v498_v11 = vsel %vm496_vm5, %v490_v10, 0 }
  0x1a   : > { %v320_v26 = vmax.f32 %v319_v25, 0.0 }
  0x1c   : > { %v321_v29 = vmin.f32 %v320_v26, 1.0 }
  0x1d   : > { %735 = vmatpush3.bf16.xpose.msra.mxu1 %v398_v13 }
  0x1e   : > { %727 = vmatpush3.bf16.xpose.msra.mxu0 %v349_v14  ;;  %748 = vmatprep.subr.bf16.mxu1 %v786_v0  ;;  %v324_v30 = vsel %vm323_vm2, %v321_v29, 0.0 }
  0x1f   : > { %740 = vmatprep.subr.bf16.mxu0 %v786_v0  ;;  %vm325_vm3 = vcmp.gt.f32.partialorder %v324_v30, 0.0 }
  0x20   : > { %v326_v35 = vsel %vm325_vm3, 0.0, %v788_v34 }
  0x24   : > { %737 = vmatmul.mubr.msk.bf16.vlgmr.msra.gmra.mrb[0].mxu1 %vm341_vm1, %v330_v17 }
  0x25   : > { %729 = vmatmul.mubr.msk.bf16.vlgmr.msra.gmra.mrb[0].mxu0 %vm341_vm1, %v329_v18  ;;  %752 = vmatprep.mubr.msk.bf16.mxu1 %vm787_vm0, %v786_v0 }
  0x26   : > { %744 = vmatprep.mubr.msk.bf16.mxu0 %vm787_vm0, %v786_v0  ;;  %749 = vmatpush3.bf16.msra.mxu1 %v491_v2 }
  0x27   : > { %750 = vmatprep.subr.bf16.mxu1 %v786_v0  ;;  %741 = vmatpush3.bf16.msra.mxu0 %v489_v7 }
  0x28   : > { %742 = vmatprep.subr.bf16.mxu0 %v786_v0 }
  0x2a   : > { %751 = vmatpush3.bf16.msra.mxu1 %v544_v8 }
  0x2b   : > { %743 = vmatpush3.bf16.msra.mxu0 %v498_v11 }
  0xf7   : > { %v434_v33 = vpop.f32.mrb[0].mxu1 }
  0xf8   : > { %v443_v36 = vadd.f32 %v441_v31, %v434_v33  ;;  %v738_v37 = vpop.f32.mrb[1].mxu1  ;;  %v385_v38 = vpop.f32.mrb[0].mxu0 }
  0xf9   : > { %v437_v39 = vpop.f32.mrb[2].mxu1  ;;  %v442_v40 = vadd.f32 %v440_v32, %v385_v38  ;;  %v730_v41 = vpop.f32.mrb[1].mxu0 }
  0xfa   : > { %v739_v42 = vpop.f32.mrb[3].mxu1  ;;  %v445_v43 = vadd.f32 %v443_v36, %v326_v35  ;;  %v388_v44 = vpop.f32.mrb[2].mxu0 }
  0xfb   : > { %v444_v45 = vadd.f32 %v442_v40, %v326_v35  ;;  %v731_v46 = vpop.f32.mrb[3].mxu0 }
  0xfc   : > { %v450_v47 = vsel %vm446_vm4, %v445_v43, -inf }
  0xfd   : > { %451 = vmax.xlane.f32.xlu0 %v450_v47  ;;  %v447_v48 = vsel %vm446_vm4, %v444_v45, -inf }
 0x101   : > { %448 = vmax.xlane.f32.xlu0 %v447_v48 }
 0x18a   : > { %v452_v49 = vpop.xlane.xlu0 %451 }
 0x18b   : > { %v454_v50 = vsub.f32 %v445_v43, %v452_v49 }
 0x18d   : > { %v457_v51 = vmul.f32 1.442695, %v454_v50 }
 0x18e   : > { %v449_v52 = vpop.xlane.xlu0 %448 }
 0x18f   : > { %770 = vpow2.f32 %v457_v51  ;;  %v453_v53 = vsub.f32 %v444_v45, %v449_v52 }
 0x191   : > { %v455_v54 = vmul.f32 1.442695, %v453_v53 }
 0x193   : > { %772 = vpow2.f32 %v455_v54 }
 0x199   : > { %v771_v55 = vpop.eup %770 }
 0x19a   : > { %v462_v56 = vsel %vm446_vm4, %v771_v55, 0.0  ;;  %v466_v57 = vmul.f32 %v771_v55, %v324_v30 }
 0x19b   : > { %463 = vadd.xlane.f32.xlu1 %v462_v56 }
 0x19c   : > { %v470_v59 = vsel %vm446_vm4, %v466_v57, 0.0 }
 0x19d   : > { %v773_v58 = vpop.eup %772 }
 0x19e   : > { %v459_v60 = vsel %vm446_vm4, %v773_v58, 0.0  ;;  %v465_v61 = vmul.f32 %v773_v58, %v324_v30 }
 0x19f   : > { %471 = vadd.xlane.f32.xlu1 %v470_v59  ;;  %460 = vadd.xlane.f32.xlu0 %v459_v60 }
 0x1a0   : > { %v467_v62 = vsel %vm446_vm4, %v465_v61, 0.0 }
 0x1a3   : > { %468 = vadd.xlane.f32.xlu1 %v467_v62 }
 0x228   : > { %v464_v12 = vpop.xlane.xlu1 %463 }
 0x229   : > { %v474_v13 = vmul.f32 1e-08, %v464_v12 }
 0x22c   : > { %v472_v14 = vpop.xlane.xlu1 %471  ;;  %v461_v15 = vpop.xlane.xlu0 %460 }
 0x22d   : > { %v476_v16 = vadd.f32 %v474_v13, %v472_v14  ;;  %v473_v17 = vmul.f32 1e-08, %v461_v15 }
 0x22f   : > { %774 = vrcp.f32 %v476_v16 }
 0x230   : > { %v469_v18 = vpop.xlane.xlu1 %468 }
 0x231   : > { %v475_v19 = vadd.f32 %v473_v17, %v469_v18 }
 0x233   : > { %776 = vrcp.f32 %v475_v19 }
 0x239   : > { %v775_v20 = vpop.eup %774 }
 0x23a   : > { %v480_v21 = vmul.f32 %v775_v20, %v466_v57 }
 0x23c   : > { %v482_v22 = vpack.c.bf16 %v480_v21, %v480_v21 }
 0x23d   : > { %v777_v23 = vpop.eup %776 }
 0x23e   : > { %v479_v24 = vmul.f32 %v777_v23, %v465_v61  ;;  %753 = vmatmul.mubr.msk.bf16.vlgmr.msra.gmra.mrb[4].mxu1 %vm446_vm4, %v482_v22 }
 0x240   : > { %v481_v0 = vpack.c.bf16 %v479_v24, %v479_v24 }
 0x242   : > { %745 = vmatmul.mubr.msk.bf16.vlgmr.msra.gmra.mrb[4].mxu0 %vm446_vm4, %v481_v0 }
 0x311   : > { %v580_v25 = vpop.f32.mrb[4].mxu1 }
 0x312   : > { %v754_v26 = vpop.f32.mrb[5].mxu1  ;;  %587 = vrot.lane.b32.xlu0 %v580_v25, %s789_s15 }
 0x313   : > { %v583_v27 = vpop.f32.mrb[6].mxu1 }
 0x314   : > { %v755_v28 = vpop.f32.mrb[7].mxu1 }
 0x315   : > { %v534_v29 = vpop.f32.mrb[4].mxu0 }
 0x316   : > { %v746_v30 = vpop.f32.mrb[5].mxu0 }
 0x317   : > { %v537_v31 = vpop.f32.mrb[6].mxu0 }
 0x318   : > { %v747_v32 = vpop.f32.mrb[7].mxu0 }
 0x384   : > { %v588_v33 = vpop.permute.xlu0 %587 }
 0x385   : > { %v590_v34 = vsel %vm341_vm1, %v534_v29, %v588_v33 }
 0x386   : > { %592 = vst.msk [vmem:[%s303_s21] sm:$0xff] %vm591_vm6, %v590_v34 }
 0x387 PF: > { %s15_s18 = sadd.s32 1, %s784_s18  }
 0x388   : > { %p12_p5 = scmp.ge.s32.totalorder %s15_s18, 4  }
 0x38a   :  { %14 = sbr.rel (!%p12_p5) target bundleno = 1 (0x1), region = 82 }

</bundles_post_ra>
